<compile_context>
chip_gen: v7x
topology: tpu7x:2x2x1
jax: 0.10.0
libtpu: 0.0.40
codegen_flags: <defaults>
</compile_context>

<pallas_src>
import jax
import jax.numpy as jnp
from jax.experimental import pallas as pl
from jax.experimental.pallas import tpu as pltpu

IN_DIM = 20
HID_DIM = 32
OUT_DIM = 2

# Per-row VMEM footprint is ~3-5 KiB (the 20-wide / 2-wide blocks are lane-padded
# to 128 lanes in VMEM), so 2048 rows/step keeps the double-buffered pipeline
# comfortably inside the 32 MiB scoped-VMEM limit requested below on every TPU
# generation.  Sweep upward (4096/8192) together with vmem_limit_bytes if the
# ~0.35 us/step overhead still shows up in profiles.
MAX_TILE_B = 2048


def _round_up(a: int, m: int) -> int:
    return ((a + m - 1) // m) * m


def _choose_tile_b(batch: int) -> int:
    if batch <= 128:
        # One block exactly covering the (tiny) batch: block dims equal to the
        # full array dims are always layout-legal; grid has a single step.
        return batch
    # Aim for >= 2 grid steps (v7x megacore) at 8-row (sublane) granularity,
    # capped so VMEM stays comfortable.
    half = -(-batch // 2)
    return min(MAX_TILE_B, _round_up(half, 8))


def mlp_softmax_kernel(x_ref, w1_ref, b1_ref, w2d_ref, b2d_ref, o_ref):
    """Fused fc1 -> ReLU -> fc2 -> softmax on one batch tile (row-major layout).

    x_ref:   (TILE_B, 20) f32  activations (natural PyTorch layout)
    w1_ref:  (20, 32)     f32  fc1 weight, pre-transposed to (in, out)
    b1_ref:  (1, 32)      f32  fc1 bias
    w2d_ref: (32, 1)      f32  fc2 row difference  w2[0,:] - w2[1,:]
    b2d_ref: (1, 1)       f32  b2[0] - b2[1]
    o_ref:   (TILE_B, 2)  f32  softmax probabilities
    """
    # fc1 + ReLU: MXU matmul with f32 accumulation, f32 elementwise (v5e-safe).
    h = jnp.dot(x_ref[...], w1_ref[...], preferred_element_type=jnp.float32)
    h = jnp.maximum(h + b1_ref[...], 0.0)                       # (TILE_B, 32)

    # 2-class softmax == sigmoid of the logit difference:
    #   d  = l0 - l1 = h @ (w2[0]-w2[1]) + (b2[0]-b2[1])
    #   p0 = 1/(1+exp(-d)),  p1 = 1 - p0
    # For very negative d, exp(-d) overflows to +inf and p0 -> 0, p1 -> 1: the
    # correct limit, no NaNs.  Exact division (no approx reciprocal).
    d = jnp.dot(h, w2d_ref[...], preferred_element_type=jnp.float32) + b2d_ref[...]
    p0 = 1.0 / (1.0 + jnp.exp(-d))                              # (TILE_B, 1)

    cls = jax.lax.broadcasted_iota(jnp.int32, o_ref.shape, 1)   # column id 0/1
    o_ref[...] = jnp.where(cls == 0, p0, 1.0 - p0)              # (TILE_B, 2)


@jax.jit
def simple_model_forward(x, w1, b1, w2, b2):
    """x: (B, 20) f32.  Params in PyTorch layout: w1 (32,20), b1 (32,), w2 (2,32), b2 (2,).

    Returns softmax(fc2(relu(fc1(x))), dim=1) as (B, 2) f32.
    """
    batch = x.shape[0]
    tile_b = _choose_tile_b(batch)
    grid = (pl.cdiv(batch, tile_b),)

    # O(1) parameter prep only -- no per-batch pre-pass over activations.
    x32 = x.astype(jnp.float32)
    w1t = w1.astype(jnp.float32).T                                # (20, 32)
    b1r = b1.astype(jnp.float32).reshape(1, HID_DIM)              # (1, 32)
    w2d = (w2[0, :] - w2[1, :]).astype(jnp.float32).reshape(HID_DIM, 1)
    b2d = (b2[0] - b2[1]).astype(jnp.float32).reshape(1, 1)

    return pl.pallas_call(
        mlp_softmax_kernel,
        out_shape=jax.ShapeDtypeStruct((batch, OUT_DIM), jnp.float32),
        grid=grid,
        in_specs=[
            pl.BlockSpec((tile_b, IN_DIM), lambda i: (i, 0)),     # batch-tiled activations
            pl.BlockSpec((IN_DIM, HID_DIM), lambda i: (0, 0)),    # params stay VMEM-resident
            pl.BlockSpec((1, HID_DIM), lambda i: (0, 0)),
            pl.BlockSpec((HID_DIM, 1), lambda i: (0, 0)),
            pl.BlockSpec((1, 1), lambda i: (0, 0)),
        ],
        out_specs=pl.BlockSpec((tile_b, OUT_DIM), lambda i: (i, 0)),
        compiler_params=pltpu.CompilerParams(
            dimension_semantics=("parallel",),    # shard batch tiles across v7x's 2 TCs
            vmem_limit_bytes=32 * 1024 * 1024,    # covers v5e's smaller scoped default
        ),
    )(x32, w1t, b1r, w2d, b2d)


def init_params(key):
    """nn.Linear-style init: uniform(-1/sqrt(fan_in), 1/sqrt(fan_in)), PyTorch layouts."""
    k1, k2, k3, k4 = jax.random.split(key, 4)
    bound1 = 1.0 / jnp.sqrt(IN_DIM)
    bound2 = 1.0 / jnp.sqrt(HID_DIM)
    w1 = jax.random.uniform(k1, (HID_DIM, IN_DIM), jnp.float32, -bound1, bound1)
    b1 = jax.random.uniform(k2, (HID_DIM,), jnp.float32, -bound1, bound1)
    w2 = jax.random.uniform(k3, (OUT_DIM, HID_DIM), jnp.float32, -bound2, bound2)
    b2 = jax.random.uniform(k4, (OUT_DIM,), jnp.float32, -bound2, bound2)
    return w1, b1, w2, b2


def reference_forward(x, w1, b1, w2, b2):
    """Pure-JAX f32 reference matching the PyTorch SimpleModel forward."""
    h = jnp.maximum(x @ w1.T + b1[None, :], 0.0)
    logits = h @ w2.T + b2[None, :]
    return jax.nn.softmax(logits, axis=1)


if __name__ == "__main__":
    key = jax.random.PRNGKey(0)
    kx, kp = jax.random.split(key)
    w1, b1, w2, b2 = init_params(kp)

    # Small single-tile case and a multi-step grid case with a ragged edge.
    for batch in (8, 200):
        kx, sub = jax.random.split(kx)
        x = jax.random.normal(sub, (batch, IN_DIM), jnp.float32)

        out = jax.block_until_ready(simple_model_forward(x, w1, b1, w2, b2))
        ref = reference_forward(x, w1, b1, w2, b2)

        assert out.shape == (batch, OUT_DIM)
        assert bool(jnp.all(jnp.isfinite(out)))
        assert bool(jnp.allclose(jnp.sum(out, axis=1), 1.0, atol=1e-5))
        assert bool(jnp.allclose(out, ref, atol=5e-3)), float(jnp.max(jnp.abs(out - ref)))

    print("KERNEL_OK")
</pallas_src>

<mosaic_0001>
module attributes {stable_mosaic.version = 11 : i64} {
  func.func @mlp_softmax_kernel(%arg0: i32, %arg1: memref<8x20xf32, #tpu.memory_space<vmem>>, %arg2: memref<20x32xf32, #tpu.memory_space<vmem>>, %arg3: memref<1x32xf32, #tpu.memory_space<vmem>>, %arg4: memref<32x1xf32, #tpu.memory_space<vmem>>, %arg5: memref<1x1xf32, #tpu.memory_space<vmem>>, %arg6: memref<8x2xf32, #tpu.memory_space<vmem>>) attributes {dimension_semantics = [#tpu.dimension_semantics<parallel>], iteration_bounds = array<i64: 1>, scalar_prefetch = 0 : i64, scratch_operands = 0 : i64, tpu.core_type = #tpu.core_type<tc>, window_params = [{transform_indices = @transform_0, window_bounds = array<i64: 8, 20>}, {pipeline_mode = #tpu.pipeline_mode<synchronous>, transform_indices = @transform_1, window_bounds = array<i64: 20, 32>}, {pipeline_mode = #tpu.pipeline_mode<synchronous>, transform_indices = @transform_2, window_bounds = array<i64: 1, 32>}, {pipeline_mode = #tpu.pipeline_mode<synchronous>, transform_indices = @transform_3, window_bounds = array<i64: 32, 1>}, {pipeline_mode = #tpu.pipeline_mode<synchronous>, transform_indices = @transform_4, window_bounds = array<i64: 1, 1>}, {transform_indices = @transform_5, window_bounds = array<i64: 8, 2>}]} {
    %c0 = arith.constant 0 : index
    %c0_0 = arith.constant 0 : index
    %0 = vector.load %arg1[%c0, %c0_0] : memref<8x20xf32, #tpu.memory_space<vmem>>, vector<8x20xf32>
    %c0_1 = arith.constant 0 : index
    %c0_2 = arith.constant 0 : index
    %1 = vector.load %arg2[%c0_1, %c0_2] : memref<20x32xf32, #tpu.memory_space<vmem>>, vector<20x32xf32>
    %cst = arith.constant dense<0.000000e+00> : vector<8x32xf32>
    %2 = tpu.matmul %0, %1, %cst {dimension_numbers = #tpu.dot_dimension_numbers<[1], [0], [0], [1], [0, 0, 1, 1], [], []>} : vector<8x20xf32>, vector<20x32xf32>, vector<8x32xf32> -> vector<8x32xf32>
    %c0_3 = arith.constant 0 : index
    %c0_4 = arith.constant 0 : index
    %3 = vector.load %arg3[%c0_3, %c0_4] : memref<1x32xf32, #tpu.memory_space<vmem>>, vector<1x32xf32>
    %4 = vector.broadcast %3 : vector<1x32xf32> to vector<8x32xf32>
    %5 = arith.addf %2, %4 : vector<8x32xf32>
    %cst_5 = arith.constant 0.000000e+00 : f32
    %6 = vector.broadcast %cst_5 : f32 to vector<8x32xf32>
    %7 = arith.maximumf %5, %6 : vector<8x32xf32>
    %c0_6 = arith.constant 0 : index
    %c0_7 = arith.constant 0 : index
    %8 = vector.load %arg4[%c0_6, %c0_7] : memref<32x1xf32, #tpu.memory_space<vmem>>, vector<32x1xf32>
    %cst_8 = arith.constant dense<0.000000e+00> : vector<8x1xf32>
    %9 = tpu.matmul %7, %8, %cst_8 {dimension_numbers = #tpu.dot_dimension_numbers<[1], [0], [0], [1], [0, 0, 1, 1], [], []>} : vector<8x32xf32>, vector<32x1xf32>, vector<8x1xf32> -> vector<8x1xf32>
    %c0_9 = arith.constant 0 : index
    %c0_10 = arith.constant 0 : index
    %10 = vector.load %arg5[%c0_9, %c0_10] : memref<1x1xf32, #tpu.memory_space<vmem>>, vector<1x1xf32>
    %11 = vector.broadcast %10 : vector<1x1xf32> to vector<8x1xf32>
    %12 = arith.addf %9, %11 : vector<8x1xf32>
    %cst_11 = arith.constant 0.000000e+00 : f32
    %13 = vector.broadcast %cst_11 : f32 to vector<8x1xf32>
    %14 = arith.subf %13, %12 : vector<8x1xf32>
    %15 = math.exp %14 : vector<8x1xf32>
    %cst_12 = arith.constant 1.000000e+00 : f32
    %16 = vector.broadcast %cst_12 : f32 to vector<8x1xf32>
    %17 = arith.addf %16, %15 : vector<8x1xf32>
    %cst_13 = arith.constant 1.000000e+00 : f32
    %18 = vector.broadcast %cst_13 : f32 to vector<8x1xf32>
    %19 = arith.divf %18, %17 : vector<8x1xf32>
    %20 = tpu.iota {dimensions = array<i32: 1>} : vector<8x2xi32>
    %c0_i32 = arith.constant 0 : i32
    %21 = vector.broadcast %c0_i32 : i32 to vector<8x2xi32>
    %22 = arith.cmpi eq, %20, %21 : vector<8x2xi32>
    %cst_14 = arith.constant 1.000000e+00 : f32
    %23 = vector.broadcast %cst_14 : f32 to vector<8x1xf32>
    %24 = arith.subf %23, %19 : vector<8x1xf32>
    %25 = vector.shape_cast %19 : vector<8x1xf32> to vector<8x1xf32>
    %26 = vector.broadcast %25 : vector<8x1xf32> to vector<8x2xf32>
    %27 = vector.shape_cast %24 : vector<8x1xf32> to vector<8x1xf32>
    %28 = vector.broadcast %27 : vector<8x1xf32> to vector<8x2xf32>
    %29 = arith.select %22, %26, %28 : vector<8x2xi1>, vector<8x2xf32>
    %c0_15 = arith.constant 0 : index
    %c0_16 = arith.constant 0 : index
    %30 = vector.load %arg6[%c0_15, %c0_16] : memref<8x2xf32, #tpu.memory_space<vmem>>, vector<8x2xf32>
    tpu.vector_store %arg6[%c0_15, %c0_16], %29 {strides = array<i32>} : memref<8x2xf32, #tpu.memory_space<vmem>>, vector<8x2xf32>,
    return
  }
  func.func @transform_0(%arg0: i32) -> (i32, i32) {
    %c0_i32 = arith.constant 0 : i32
    %c0_i32_0 = arith.constant 0 : i32
    return %arg0, %c0_i32 : i32, i32
  }
  func.func @transform_1(%arg0: i32) -> (i32, i32) {
    %c0_i32 = arith.constant 0 : i32
    %c0_i32_0 = arith.constant 0 : i32
    %c0_i32_1 = arith.constant 0 : i32
    return %c0_i32, %c0_i32_0 : i32, i32
  }
  func.func @transform_2(%arg0: i32) -> (i32, i32) {
    %c0_i32 = arith.constant 0 : i32
    %c0_i32_0 = arith.constant 0 : i32
    %c0_i32_1 = arith.constant 0 : i32
    return %c0_i32, %c0_i32_0 : i32, i32
  }
  func.func @transform_3(%arg0: i32) -> (i32, i32) {
    %c0_i32 = arith.constant 0 : i32
    %c0_i32_0 = arith.constant 0 : i32
    %c0_i32_1 = arith.constant 0 : i32
    return %c0_i32, %c0_i32_0 : i32, i32
  }
  func.func @transform_4(%arg0: i32) -> (i32, i32) {
    %c0_i32 = arith.constant 0 : i32
    %c0_i32_0 = arith.constant 0 : i32
    %c0_i32_1 = arith.constant 0 : i32
    return %c0_i32, %c0_i32_0 : i32, i32
  }
  func.func @transform_5(%arg0: i32) -> (i32, i32) {
    %c0_i32 = arith.constant 0 : i32
    %c0_i32_0 = arith.constant 0 : i32
    return %arg0, %c0_i32 : i32, i32
  }
}

</mosaic_0001>

<bundles_post_ra>
// kernel: simple_model_forward.1
= control target key start
LH: loop header
LB: loop body
LE: loop exit
PB: predicated region body
PF: predicated region fallthrough
CT: control target
= control target key end

     0   :  { %v276_v0 = vmov 0.0|0.0   ;;  %vm277_vm0 = vmmov 0   ;;  %v278_v3 = vmov 0.0   ;;  %vm37_vm1 = vcmask 1043456   ;;  %s343_s1 = inlined_call_operand.vmem [shape: f32[20,32], index: 1, kind: input, shape index: {}]   ;;  %s344_s3 = inlined_call_operand.vmem [shape: f32[32,1], index: 3, kind: input, shape index: {}]   ;;  %s345_s0 = inlined_call_operand.vmem [shape: f32[8,20], index: 0, kind: input, shape index: {}]   ;;  %s346_s4 = inlined_call_operand.<no memory space> [shape: f32[1,1], index: 4, kind: input, shape index: {}]   ;;  %s347_s2 = inlined_call_operand.vmem [shape: f32[1,32], index: 2, kind: input, shape index: {}]   ;;  %s348_s5 = inlined_call_operand.vmem [shape: f32[8,2], index: 5, kind: output, shape index: {}]  }
   0x1   :  { %258 = vmatprep.subr.bf16.mxu0 %v276_v0  ;;  %v23_v1 = vld [vmem:[%s343_s1] sm:$0xff]  ;;  %v24_v2 = vld [vmem:[%s343_s1 + $0x8] sm:$0xff]  ;;  %244 = vmatprep.mubr.msk.f32.mxu0 %vm277_vm0, %v278_v3  ;;  %v25_v8 = vld [vmem:[%s343_s1 + $0x10] sm:$0xf]  ;;  %vm33_vm2 = vcmask 162816   ;;  %v10_v13 = vstv %s346_s4  ;;  %vm123_vm3 = vcmask 261120   ;;  %v203_v30 = vlaneseq }
   0x2   :  { %v259_v4 = vpack.c.bf16 %v24_v2, %v23_v1  ;;  %261 = vmatprep.subr.bf16.mxu1 %v276_v0  ;;  %v112_v5 = vld [vmem:[%s344_s3] sm:$0xff]  ;;  %v113_v6 = vld [vmem:[%s344_s3 + $0x8] sm:$0xff]  ;;  %255 = vmatprep.mubr.msk.f32.mxu1 %vm277_vm0, %v278_v3  ;;  %v114_v10 = vld [vmem:[%s344_s3 + $0x10] sm:$0xff]  ;;  %11 = vst [vmem:[#allocation2] sm:$0x1] %v10_v13  ;;  %v279_v19 = vmov 0  }
   0x3   :  { %v262_v7 = vpack.c.bf16 %v113_v6, %v112_v5  ;;  %v22_v9 = vld [vmem:[%s345_s0] sm:$0xff]  ;;  %v115_v11 = vld [vmem:[%s344_s3 + $0x18] sm:$0xff]  ;;  %271 = vset.pattern.permute.xlu0 %v279_v19  ;;  %v204_v31 = vand.u32 127, %v203_v30  ;;  %vm218_vm5 = vcmask 15360  }
   0x4   :  { %260 = vmatpush3.bf16.msra.mxu0 %v259_v4  ;;  %v265_v12 = vpack.c.bf16 %v115_v11, %v114_v10  ;;  %v224_v14 = vld [vmem:[%s347_s2] ss:$0 sm:$0xff] }
   0x5   :  { %242 = vmatprep.subr.mxu0 %v278_v3  ;;  %263 = vmatpush3.bf16.msra.mxu1 %v262_v7  ;;  %vm205_vm4 = vcmp.eq.s32.totalorder %v204_v31, 0 }
   0x6   :  { %264 = vmatprep.subr.bf16.mxu1 %v276_v0 }
   0x8   :  { %243 = vmatpush3.msk.msra.mxu0 %vm37_vm1, %v25_v8 }
   0x9   :  { %245 = vmatmul.mubr.msk.f32.vlgmr.msra.gmra.mrb[0].mxu0 %vm33_vm2, %v22_v9  ;;  %266 = vmatpush3.bf16.msra.mxu1 %v265_v12  ;;  %v227_v20 = vld [vmem:[#allocation2] ss:$0 sm:$0xff] }
  0xdc   :  { %v107_v15 = vpop.f32.mrb[0].mxu0 }
  0xdd   :  { %v108_v16 = vadd.f32 %v224_v14, %v107_v15  ;;  %v246_v17 = vpop.f32.mrb[1].mxu0 }
  0xdf   :  { %v111_v18 = vmax.f32 %v108_v16, 0.0 }
  0xe1   :  { %256 = vmatmul.mubr.msk.f32.vlgmr.msra.gmra.mrb[0].mxu1 %vm123_vm3, %v111_v18 }
 0x1b4   :  { %v193_v21 = vpop.f32.mrb[0].mxu1 }
 0x1b5   :  { %v194_v22 = vadd.f32 %v227_v20, %v193_v21  ;;  %v257_v23 = vpop.f32.mrb[1].mxu1 }
 0x1b7   :  { %v197_v24 = vsub.f32 0.0, %v194_v22 }
 0x1b9   :  { %v198_v25 = vmul.f32 1.442695, %v197_v24 }
 0x1bb   :  { %272 = vpow2.f32 %v198_v25 }
 0x1c5   :  { %v273_v26 = vpop.eup %272 }
 0x1c6   :  { %v200_v27 = vadd.f32 1.0, %v273_v26 }
 0x1c8   :  { %274 = vrcp.f32 %v200_v27 }
 0x1d2   :  { %v275_v28 = vpop.eup %274 }
 0x1d3   :  { %209 = vperm.xlu0 %271, %v275_v28   ;;  %v206_v29 = vsub.f32 1.0, %v275_v28 }
 0x1d7   :  { %214 = vperm.xlu0 %271, %v206_v29  }
 0x252   :  { %v210_v32 = vpop.permute.xlu0 %209 }
 0x256   :  { %v215_v33 = vpop.permute.xlu0 %214 }
 0x257   :  { %v217_v34 = vsel %vm205_vm4, %v210_v32, %v215_v33 }
 0x258   :  { %219 = vst.msk [vmem:[%s348_s5] sm:$0xff] %vm218_vm5, %v217_v34 }

</bundles_post_ra>
